<compile_context>
chip_gen: v7x
topology: tpu7x:2x2x1
jax: 0.10.0
libtpu: 0.0.40
codegen_flags: <defaults>
</compile_context>

<pallas_src>
import jax
import jax.numpy as jnp
import numpy as np
from jax import lax
from jax.experimental import pallas as pl
from jax.experimental.pallas import tpu as pltpu


def _fused_convs_kernel(g_ref, w1_ref, b1_ref, w2_ref, b2_ref, o_ref, v0_ref):
    """
    g_ref : (9, 64, 256)  stride-4 sub-grids of the padded input, [3r+s, c0, 16i+j]
    w1_ref: (4, 8, 64)    conv1 weight  [2kh+kw, c1, c0]
    b1_ref: (8, 1)        conv1 bias
    w2_ref: (64, 32)      conv2 weight  [c2, 8*(2kh2+kw2) + c1]
    b2_ref: (64, 1)       conv2 bias
    o_ref : (64, 256)     conv2 output  [c2, 16i+j]  (== NCHW (64, 16, 16))
    v0_ref: (32, 256)     VMEM scratch: conv1 output, rows = 8*(2a+b) + c1
    """
    bias1 = b1_ref[...]                                    # (8, 1)

    # conv1: for each output-parity (a, b), accumulate the four kernel taps.
    for a in range(2):
        for b in range(2):
            acc = jnp.zeros((8, 256), jnp.float32)
            for kh in range(2):
                for kw in range(2):
                    acc = acc + jnp.dot(
                        w1_ref[2 * kh + kw],               # (8, 64)
                        g_ref[3 * (a + kh) + (b + kw)],    # (64, 256)
                        preferred_element_type=jnp.float32)
            row = 8 * (2 * a + b)
            v0_ref[row:row + 8, :] = acc + bias1           # lane-dense store

    # conv2: single matmul over the parity-major conv1 result (K = 32).
    out = jnp.dot(w2_ref[...], v0_ref[...], preferred_element_type=jnp.float32)
    o_ref[...] = out + b2_ref[...]


def fused_convs(g9, w1m, b1m, w2m, b2m):
    return pl.pallas_call(
        _fused_convs_kernel,
        out_shape=jax.ShapeDtypeStruct((64, 256), jnp.float32),
        grid_spec=pltpu.PrefetchScalarGridSpec(
            num_scalar_prefetch=0,
            grid=(1,),
            in_specs=[
                pl.BlockSpec((9, 64, 256), lambda i: (0, 0, 0)),
                pl.BlockSpec((4, 8, 64), lambda i: (0, 0, 0)),
                pl.BlockSpec((8, 1), lambda i: (0, 0)),
                pl.BlockSpec((64, 32), lambda i: (0, 0)),
                pl.BlockSpec((64, 1), lambda i: (0, 0)),
            ],
            out_specs=pl.BlockSpec((64, 256), lambda i: (0, 0)),
            scratch_shapes=[pltpu.VMEM((32, 256), jnp.float32)],
        ),
        compiler_params=pltpu.CompilerParams(
            dimension_semantics=("arbitrary",)),
    )(g9, w1m, b1m, w2m, b2m)


@jax.jit
def model_forward(x_nchw, params):
    """Reproduces Model.forward for a (1, 64, 64, 64) NCHW input."""
    conv1_w, conv1_b, conv2_w, conv2_b = params
    x_chw = x_nchw[0]                                      # (64, 64, 64) CHW
    xp = jnp.pad(x_chw, ((0, 0), (1, 1), (1, 1)))          # (64, 66, 66)

    # Nine stride-4 sub-grids: G[3r+s][c, 16*i+j] = xp[c, 4i+2r, 4j+2s].
    g9 = jnp.stack(
        [xp[:, 2 * r:2 * r + 64:4, 2 * s:2 * s + 64:4].reshape(64, 256)
         for r in range(3) for s in range(3)], axis=0)     # (9, 64, 256)

    # conv1 weight -> [tap, cout, cin]; conv2 weight -> [cout, 8*tap + cin].
    w1m = jnp.transpose(conv1_w, (2, 3, 0, 1)).reshape(4, 8, 64)
    b1m = conv1_b.reshape(8, 1).astype(jnp.float32)
    w2m = jnp.transpose(conv2_w, (0, 2, 3, 1)).reshape(64, 32)
    b2m = conv2_b.reshape(64, 1).astype(jnp.float32)

    v1 = fused_convs(g9, w1m, b1m, w2m, b2m).reshape(1, 64, 16, 16)
    # TODO(synk): fold ConstantPad2d into the kernel epilogue (needs an
    # in-kernel (64,256)->(64,16,16) relayout + offset store); kept as a tiny
    # layout-only jnp.pad for now.
    return jnp.pad(v1, ((0, 0), (0, 0), (1, 1), (1, 1)))   # (1, 64, 18, 18)


@jax.jit
def reference_forward(x, params):
    """Pure-JAX reference (lax conv) to validate the Pallas path."""
    w0, b0, w1, b1 = params
    dn = ("NCHW", "OIHW", "NCHW")
    v0 = lax.conv_general_dilated(x, w0, (2, 2), ((1, 1), (1, 1)),
                                  rhs_dilation=(2, 2), dimension_numbers=dn)
    v0 = v0 + b0.reshape(1, -1, 1, 1)
    v1 = lax.conv_general_dilated(v0, w1, (2, 2), ((0, 0), (0, 0)),
                                  dimension_numbers=dn)
    v1 = v1 + b1.reshape(1, -1, 1, 1)
    return jnp.pad(v1, ((0, 0), (0, 0), (1, 1), (1, 1)))


if __name__ == "__main__":
    key = jax.random.PRNGKey(0)
    k_x, k_w0, k_b0, k_w1, k_b1 = jax.random.split(key, 5)

    # Input matching the module's x1 = torch.randn(1, 64, 64, 64) (NCHW).
    x = jax.random.normal(k_x, (1, 64, 64, 64), dtype=jnp.float32)

    # Deterministic Conv2d-style init (uniform, fan-in scaled).
    def _u(k, shape, fan_in):
        bound = 1.0 / np.sqrt(fan_in)
        return jax.random.uniform(k, shape, jnp.float32, -bound, bound)

    w0 = _u(k_w0, (8, 64, 2, 2), 64 * 2 * 2)    # Conv2d(64, 8, k=2, d=2, p=1)
    b0 = _u(k_b0, (8,), 64 * 2 * 2)
    w1 = _u(k_w1, (64, 8, 2, 2), 8 * 2 * 2)     # Conv2d(8, 64, k=2, s=2)
    b1 = _u(k_b1, (64,), 8 * 2 * 2)
    params = (w0, b0, w1, b1)

    out = jax.block_until_ready(model_forward(x, params))
    ref = jax.block_until_ready(reference_forward(x, params))

    assert out.shape == (1, 64, 18, 18), out.shape
    np.testing.assert_allclose(np.asarray(out), np.asarray(ref),
                               rtol=1e-4, atol=1e-4)
    print("KERNEL_OK")
</pallas_src>

<mosaic_0001>
module attributes {stable_mosaic.version = 11 : i64} {
  func.func @_fused_convs_kernel(%arg0: i32, %arg1: memref<9x64x256xf32, #tpu.memory_space<vmem>>, %arg2: memref<4x8x64xf32, #tpu.memory_space<vmem>>, %arg3: memref<8x1xf32, #tpu.memory_space<vmem>>, %arg4: memref<64x32xf32, #tpu.memory_space<vmem>>, %arg5: memref<64x1xf32, #tpu.memory_space<vmem>>, %arg6: memref<64x256xf32, #tpu.memory_space<vmem>>, %arg7: memref<32x256xf32, #tpu.memory_space<vmem>>) attributes {dimension_semantics = [#tpu.dimension_semantics<arbitrary>], iteration_bounds = array<i64: 1>, scalar_prefetch = 0 : i64, scratch_operands = 1 : i64, tpu.core_type = #tpu.core_type<tc>, window_params = [{pipeline_mode = #tpu.pipeline_mode<synchronous>, transform_indices = @transform_0, window_bounds = array<i64: 9, 64, 256>}, {pipeline_mode = #tpu.pipeline_mode<synchronous>, transform_indices = @transform_1, window_bounds = array<i64: 4, 8, 64>}, {pipeline_mode = #tpu.pipeline_mode<synchronous>, transform_indices = @transform_2, window_bounds = array<i64: 8, 1>}, {pipeline_mode = #tpu.pipeline_mode<synchronous>, transform_indices = @transform_3, window_bounds = array<i64: 64, 32>}, {pipeline_mode = #tpu.pipeline_mode<synchronous>, transform_indices = @transform_4, window_bounds = array<i64: 64, 1>}, {pipeline_mode = #tpu.pipeline_mode<synchronous>, transform_indices = @transform_5, window_bounds = array<i64: 64, 256>}]} {
    %c0 = arith.constant 0 : index
    %c0_0 = arith.constant 0 : index
    %0 = vector.load %arg3[%c0, %c0_0] : memref<8x1xf32, #tpu.memory_space<vmem>>, vector<8x1xf32>
    %cst = arith.constant 0.000000e+00 : f32
    %1 = vector.broadcast %cst : f32 to vector<8x256xf32>
    %c0_1 = arith.constant 0 : index
    %c0_2 = arith.constant 0 : index
    %c0_3 = arith.constant 0 : index
    %2 = vector.load %arg2[%c0_1, %c0_2, %c0_3] : memref<4x8x64xf32, #tpu.memory_space<vmem>>, vector<1x8x64xf32>
    %3 = vector.shape_cast %2 : vector<1x8x64xf32> to vector<8x64xf32>
    %c0_4 = arith.constant 0 : index
    %c0_5 = arith.constant 0 : index
    %c0_6 = arith.constant 0 : index
    %4 = vector.load %arg1[%c0_4, %c0_5, %c0_6] : memref<9x64x256xf32, #tpu.memory_space<vmem>>, vector<1x64x256xf32>
    %5 = vector.shape_cast %4 : vector<1x64x256xf32> to vector<64x256xf32>
    %cst_7 = arith.constant dense<0.000000e+00> : vector<8x256xf32>
    %6 = tpu.matmul %3, %5, %cst_7 {dimension_numbers = #tpu.dot_dimension_numbers<[1], [0], [0], [1], [0, 0, 1, 1], [], []>} : vector<8x64xf32>, vector<64x256xf32>, vector<8x256xf32> -> vector<8x256xf32>
    %7 = arith.addf %1, %6 : vector<8x256xf32>
    %c1 = arith.constant 1 : index
    %c0_8 = arith.constant 0 : index
    %c0_9 = arith.constant 0 : index
    %8 = vector.load %arg2[%c1, %c0_8, %c0_9] : memref<4x8x64xf32, #tpu.memory_space<vmem>>, vector<1x8x64xf32>
    %9 = vector.shape_cast %8 : vector<1x8x64xf32> to vector<8x64xf32>
    %c1_10 = arith.constant 1 : index
    %c0_11 = arith.constant 0 : index
    %c0_12 = arith.constant 0 : index
    %10 = vector.load %arg1[%c1_10, %c0_11, %c0_12] : memref<9x64x256xf32, #tpu.memory_space<vmem>>, vector<1x64x256xf32>
    %11 = vector.shape_cast %10 : vector<1x64x256xf32> to vector<64x256xf32>
    %cst_13 = arith.constant dense<0.000000e+00> : vector<8x256xf32>
    %12 = tpu.matmul %9, %11, %cst_13 {dimension_numbers = #tpu.dot_dimension_numbers<[1], [0], [0], [1], [0, 0, 1, 1], [], []>} : vector<8x64xf32>, vector<64x256xf32>, vector<8x256xf32> -> vector<8x256xf32>
    %13 = arith.addf %7, %12 : vector<8x256xf32>
    %c2 = arith.constant 2 : index
    %c0_14 = arith.constant 0 : index
    %c0_15 = arith.constant 0 : index
    %14 = vector.load %arg2[%c2, %c0_14, %c0_15] : memref<4x8x64xf32, #tpu.memory_space<vmem>>, vector<1x8x64xf32>
    %15 = vector.shape_cast %14 : vector<1x8x64xf32> to vector<8x64xf32>
    %c3 = arith.constant 3 : index
    %c0_16 = arith.constant 0 : index
    %c0_17 = arith.constant 0 : index
    %16 = vector.load %arg1[%c3, %c0_16, %c0_17] : memref<9x64x256xf32, #tpu.memory_space<vmem>>, vector<1x64x256xf32>
    %17 = vector.shape_cast %16 : vector<1x64x256xf32> to vector<64x256xf32>
    %cst_18 = arith.constant dense<0.000000e+00> : vector<8x256xf32>
    %18 = tpu.matmul %15, %17, %cst_18 {dimension_numbers = #tpu.dot_dimension_numbers<[1], [0], [0], [1], [0, 0, 1, 1], [], []>} : vector<8x64xf32>, vector<64x256xf32>, vector<8x256xf32> -> vector<8x256xf32>
    %19 = arith.addf %13, %18 : vector<8x256xf32>
    %c3_19 = arith.constant 3 : index
    %c0_20 = arith.constant 0 : index
    %c0_21 = arith.constant 0 : index
    %20 = vector.load %arg2[%c3_19, %c0_20, %c0_21] : memref<4x8x64xf32, #tpu.memory_space<vmem>>, vector<1x8x64xf32>
    %21 = vector.shape_cast %20 : vector<1x8x64xf32> to vector<8x64xf32>
    %c4 = arith.constant 4 : index
    %c0_22 = arith.constant 0 : index
    %c0_23 = arith.constant 0 : index
    %22 = vector.load %arg1[%c4, %c0_22, %c0_23] : memref<9x64x256xf32, #tpu.memory_space<vmem>>, vector<1x64x256xf32>
    %23 = vector.shape_cast %22 : vector<1x64x256xf32> to vector<64x256xf32>
    %cst_24 = arith.constant dense<0.000000e+00> : vector<8x256xf32>
    %24 = tpu.matmul %21, %23, %cst_24 {dimension_numbers = #tpu.dot_dimension_numbers<[1], [0], [0], [1], [0, 0, 1, 1], [], []>} : vector<8x64xf32>, vector<64x256xf32>, vector<8x256xf32> -> vector<8x256xf32>
    %25 = arith.addf %19, %24 : vector<8x256xf32>
    %26 = vector.broadcast %0 : vector<8x1xf32> to vector<8x256xf32>
    %27 = arith.addf %25, %26 : vector<8x256xf32>
    %c0_25 = arith.constant 0 : index
    %c0_26 = arith.constant 0 : index
    %28 = vector.load %arg7[%c0_25, %c0_26] : memref<32x256xf32, #tpu.memory_space<vmem>>, vector<8x256xf32>
    tpu.vector_store %arg7[%c0_25, %c0_26], %27 {strides = array<i32>} : memref<32x256xf32, #tpu.memory_space<vmem>>, vector<8x256xf32>,
    %cst_27 = arith.constant 0.000000e+00 : f32
    %29 = vector.broadcast %cst_27 : f32 to vector<8x256xf32>
    %c0_28 = arith.constant 0 : index
    %c0_29 = arith.constant 0 : index
    %c0_30 = arith.constant 0 : index
    %30 = vector.load %arg2[%c0_28, %c0_29, %c0_30] : memref<4x8x64xf32, #tpu.memory_space<vmem>>, vector<1x8x64xf32>
    %31 = vector.shape_cast %30 : vector<1x8x64xf32> to vector<8x64xf32>
    %c1_31 = arith.constant 1 : index
    %c0_32 = arith.constant 0 : index
    %c0_33 = arith.constant 0 : index
    %32 = vector.load %arg1[%c1_31, %c0_32, %c0_33] : memref<9x64x256xf32, #tpu.memory_space<vmem>>, vector<1x64x256xf32>
    %33 = vector.shape_cast %32 : vector<1x64x256xf32> to vector<64x256xf32>
    %cst_34 = arith.constant dense<0.000000e+00> : vector<8x256xf32>
    %34 = tpu.matmul %31, %33, %cst_34 {dimension_numbers = #tpu.dot_dimension_numbers<[1], [0], [0], [1], [0, 0, 1, 1], [], []>} : vector<8x64xf32>, vector<64x256xf32>, vector<8x256xf32> -> vector<8x256xf32>
    %35 = arith.addf %29, %34 : vector<8x256xf32>
    %c1_35 = arith.constant 1 : index
    %c0_36 = arith.constant 0 : index
    %c0_37 = arith.constant 0 : index
    %36 = vector.load %arg2[%c1_35, %c0_36, %c0_37] : memref<4x8x64xf32, #tpu.memory_space<vmem>>, vector<1x8x64xf32>
    %37 = vector.shape_cast %36 : vector<1x8x64xf32> to vector<8x64xf32>
    %c2_38 = arith.constant 2 : index
    %c0_39 = arith.constant 0 : index
    %c0_40 = arith.constant 0 : index
    %38 = vector.load %arg1[%c2_38, %c0_39, %c0_40] : memref<9x64x256xf32, #tpu.memory_space<vmem>>, vector<1x64x256xf32>
    %39 = vector.shape_cast %38 : vector<1x64x256xf32> to vector<64x256xf32>
    %cst_41 = arith.constant dense<0.000000e+00> : vector<8x256xf32>
    %40 = tpu.matmul %37, %39, %cst_41 {dimension_numbers = #tpu.dot_dimension_numbers<[1], [0], [0], [1], [0, 0, 1, 1], [], []>} : vector<8x64xf32>, vector<64x256xf32>, vector<8x256xf32> -> vector<8x256xf32>
    %41 = arith.addf %35, %40 : vector<8x256xf32>
    %c2_42 = arith.constant 2 : index
    %c0_43 = arith.constant 0 : index
    %c0_44 = arith.constant 0 : index
    %42 = vector.load %arg2[%c2_42, %c0_43, %c0_44] : memref<4x8x64xf32, #tpu.memory_space<vmem>>, vector<1x8x64xf32>
    %43 = vector.shape_cast %42 : vector<1x8x64xf32> to vector<8x64xf32>
    %c4_45 = arith.constant 4 : index
    %c0_46 = arith.constant 0 : index
    %c0_47 = arith.constant 0 : index
    %44 = vector.load %arg1[%c4_45, %c0_46, %c0_47] : memref<9x64x256xf32, #tpu.memory_space<vmem>>, vector<1x64x256xf32>
    %45 = vector.shape_cast %44 : vector<1x64x256xf32> to vector<64x256xf32>
    %cst_48 = arith.constant dense<0.000000e+00> : vector<8x256xf32>
    %46 = tpu.matmul %43, %45, %cst_48 {dimension_numbers = #tpu.dot_dimension_numbers<[1], [0], [0], [1], [0, 0, 1, 1], [], []>} : vector<8x64xf32>, vector<64x256xf32>, vector<8x256xf32> -> vector<8x256xf32>
    %47 = arith.addf %41, %46 : vector<8x256xf32>
    %c3_49 = arith.constant 3 : index
    %c0_50 = arith.constant 0 : index
    %c0_51 = arith.constant 0 : index
    %48 = vector.load %arg2[%c3_49, %c0_50, %c0_51] : memref<4x8x64xf32, #tpu.memory_space<vmem>>, vector<1x8x64xf32>
    %49 = vector.shape_cast %48 : vector<1x8x64xf32> to vector<8x64xf32>
    %c5 = arith.constant 5 : index
    %c0_52 = arith.constant 0 : index
    %c0_53 = arith.constant 0 : index
    %50 = vector.load %arg1[%c5, %c0_52, %c0_53] : memref<9x64x256xf32, #tpu.memory_space<vmem>>, vector<1x64x256xf32>
    %51 = vector.shape_cast %50 : vector<1x64x256xf32> to vector<64x256xf32>
    %cst_54 = arith.constant dense<0.000000e+00> : vector<8x256xf32>
    %52 = tpu.matmul %49, %51, %cst_54 {dimension_numbers = #tpu.dot_dimension_numbers<[1], [0], [0], [1], [0, 0, 1, 1], [], []>} : vector<8x64xf32>, vector<64x256xf32>, vector<8x256xf32> -> vector<8x256xf32>
    %53 = arith.addf %47, %52 : vector<8x256xf32>
    %54 = vector.broadcast %0 : vector<8x1xf32> to vector<8x256xf32>
    %55 = arith.addf %53, %54 : vector<8x256xf32>
    %c8 = arith.constant 8 : index
    %c0_55 = arith.constant 0 : index
    %56 = vector.load %arg7[%c8, %c0_55] : memref<32x256xf32, #tpu.memory_space<vmem>>, vector<8x256xf32>
    tpu.vector_store %arg7[%c8, %c0_55], %55 {strides = array<i32>} : memref<32x256xf32, #tpu.memory_space<vmem>>, vector<8x256xf32>,
    %cst_56 = arith.constant 0.000000e+00 : f32
    %57 = vector.broadcast %cst_56 : f32 to vector<8x256xf32>
    %c0_57 = arith.constant 0 : index
    %c0_58 = arith.constant 0 : index
    %c0_59 = arith.constant 0 : index
    %58 = vector.load %arg2[%c0_57, %c0_58, %c0_59] : memref<4x8x64xf32, #tpu.memory_space<vmem>>, vector<1x8x64xf32>
    %59 = vector.shape_cast %58 : vector<1x8x64xf32> to vector<8x64xf32>
    %c3_60 = arith.constant 3 : index
    %c0_61 = arith.constant 0 : index
    %c0_62 = arith.constant 0 : index
    %60 = vector.load %arg1[%c3_60, %c0_61, %c0_62] : memref<9x64x256xf32, #tpu.memory_space<vmem>>, vector<1x64x256xf32>
    %61 = vector.shape_cast %60 : vector<1x64x256xf32> to vector<64x256xf32>
    %cst_63 = arith.constant dense<0.000000e+00> : vector<8x256xf32>
    %62 = tpu.matmul %59, %61, %cst_63 {dimension_numbers = #tpu.dot_dimension_numbers<[1], [0], [0], [1], [0, 0, 1, 1], [], []>} : vector<8x64xf32>, vector<64x256xf32>, vector<8x256xf32> -> vector<8x256xf32>
    %63 = arith.addf %57, %62 : vector<8x256xf32>
    %c1_64 = arith.constant 1 : index
    %c0_65 = arith.constant 0 : index
    %c0_66 = arith.constant 0 : index
    %64 = vector.load %arg2[%c1_64, %c0_65, %c0_66] : memref<4x8x64xf32, #tpu.memory_space<vmem>>, vector<1x8x64xf32>
    %65 = vector.shape_cast %64 : vector<1x8x64xf32> to vector<8x64xf32>
    %c4_67 = arith.constant 4 : index
    %c0_68 = arith.constant 0 : index
    %c0_69 = arith.constant 0 : index
    %66 = vector.load %arg1[%c4_67, %c0_68, %c0_69] : memref<9x64x256xf32, #tpu.memory_space<vmem>>, vector<1x64x256xf32>
    %67 = vector.shape_cast %66 : vector<1x64x256xf32> to vector<64x256xf32>
    %cst_70 = arith.constant dense<0.000000e+00> : vector<8x256xf32>
    %68 = tpu.matmul %65, %67, %cst_70 {dimension_numbers = #tpu.dot_dimension_numbers<[1], [0], [0], [1], [0, 0, 1, 1], [], []>} : vector<8x64xf32>, vector<64x256xf32>, vector<8x256xf32> -> vector<8x256xf32>
    %69 = arith.addf %63, %68 : vector<8x256xf32>
    %c2_71 = arith.constant 2 : index
    %c0_72 = arith.constant 0 : index
    %c0_73 = arith.constant 0 : index
    %70 = vector.load %arg2[%c2_71, %c0_72, %c0_73] : memref<4x8x64xf32, #tpu.memory_space<vmem>>, vector<1x8x64xf32>
    %71 = vector.shape_cast %70 : vector<1x8x64xf32> to vector<8x64xf32>
    %c6 = arith.constant 6 : index
    %c0_74 = arith.constant 0 : index
    %c0_75 = arith.constant 0 : index
    %72 = vector.load %arg1[%c6, %c0_74, %c0_75] : memref<9x64x256xf32, #tpu.memory_space<vmem>>, vector<1x64x256xf32>
    %73 = vector.shape_cast %72 : vector<1x64x256xf32> to vector<64x256xf32>
    %cst_76 = arith.constant dense<0.000000e+00> : vector<8x256xf32>
    %74 = tpu.matmul %71, %73, %cst_76 {dimension_numbers = #tpu.dot_dimension_numbers<[1], [0], [0], [1], [0, 0, 1, 1], [], []>} : vector<8x64xf32>, vector<64x256xf32>, vector<8x256xf32> -> vector<8x256xf32>
    %75 = arith.addf %69, %74 : vector<8x256xf32>
    %c3_77 = arith.constant 3 : index
    %c0_78 = arith.constant 0 : index
    %c0_79 = arith.constant 0 : index
    %76 = vector.load %arg2[%c3_77, %c0_78, %c0_79] : memref<4x8x64xf32, #tpu.memory_space<vmem>>, vector<1x8x64xf32>
    %77 = vector.shape_cast %76 : vector<1x8x64xf32> to vector<8x64xf32>
    %c7 = arith.constant 7 : index
    %c0_80 = arith.constant 0 : index
    %c0_81 = arith.constant 0 : index
    %78 = vector.load %arg1[%c7, %c0_80, %c0_81] : memref<9x64x256xf32, #tpu.memory_space<vmem>>, vector<1x64x256xf32>
    %79 = vector.shape_cast %78 : vector<1x64x256xf32> to vector<64x256xf32>
    %cst_82 = arith.constant dense<0.000000e+00> : vector<8x256xf32>
    %80 = tpu.matmul %77, %79, %cst_82 {dimension_numbers = #tpu.dot_dimension_numbers<[1], [0], [0], [1], [0, 0, 1, 1], [], []>} : vector<8x64xf32>, vector<64x256xf32>, vector<8x256xf32> -> vector<8x256xf32>
    %81 = arith.addf %75, %80 : vector<8x256xf32>
    %82 = vector.broadcast %0 : vector<8x1xf32> to vector<8x256xf32>
    %83 = arith.addf %81, %82 : vector<8x256xf32>
    %c16 = arith.constant 16 : index
    %c0_83 = arith.constant 0 : index
    %84 = vector.load %arg7[%c16, %c0_83] : memref<32x256xf32, #tpu.memory_space<vmem>>, vector<8x256xf32>
    tpu.vector_store %arg7[%c16, %c0_83], %83 {strides = array<i32>} : memref<32x256xf32, #tpu.memory_space<vmem>>, vector<8x256xf32>,
    %cst_84 = arith.constant 0.000000e+00 : f32
    %85 = vector.broadcast %cst_84 : f32 to vector<8x256xf32>
    %c0_85 = arith.constant 0 : index
    %c0_86 = arith.constant 0 : index
    %c0_87 = arith.constant 0 : index
    %86 = vector.load %arg2[%c0_85, %c0_86, %c0_87] : memref<4x8x64xf32, #tpu.memory_space<vmem>>, vector<1x8x64xf32>
    %87 = vector.shape_cast %86 : vector<1x8x64xf32> to vector<8x64xf32>
    %c4_88 = arith.constant 4 : index
    %c0_89 = arith.constant 0 : index
    %c0_90 = arith.constant 0 : index
    %88 = vector.load %arg1[%c4_88, %c0_89, %c0_90] : memref<9x64x256xf32, #tpu.memory_space<vmem>>, vector<1x64x256xf32>
    %89 = vector.shape_cast %88 : vector<1x64x256xf32> to vector<64x256xf32>
    %cst_91 = arith.constant dense<0.000000e+00> : vector<8x256xf32>
    %90 = tpu.matmul %87, %89, %cst_91 {dimension_numbers = #tpu.dot_dimension_numbers<[1], [0], [0], [1], [0, 0, 1, 1], [], []>} : vector<8x64xf32>, vector<64x256xf32>, vector<8x256xf32> -> vector<8x256xf32>
    %91 = arith.addf %85, %90 : vector<8x256xf32>
    %c1_92 = arith.constant 1 : index
    %c0_93 = arith.constant 0 : index
    %c0_94 = arith.constant 0 : index
    %92 = vector.load %arg2[%c1_92, %c0_93, %c0_94] : memref<4x8x64xf32, #tpu.memory_space<vmem>>, vector<1x8x64xf32>
    %93 = vector.shape_cast %92 : vector<1x8x64xf32> to vector<8x64xf32>
    %c5_95 = arith.constant 5 : index
    %c0_96 = arith.constant 0 : index
    %c0_97 = arith.constant 0 : index
    %94 = vector.load %arg1[%c5_95, %c0_96, %c0_97] : memref<9x64x256xf32, #tpu.memory_space<vmem>>, vector<1x64x256xf32>
    %95 = vector.shape_cast %94 : vector<1x64x256xf32> to vector<64x256xf32>
    %cst_98 = arith.constant dense<0.000000e+00> : vector<8x256xf32>
    %96 = tpu.matmul %93, %95, %cst_98 {dimension_numbers = #tpu.dot_dimension_numbers<[1], [0], [0], [1], [0, 0, 1, 1], [], []>} : vector<8x64xf32>, vector<64x256xf32>, vector<8x256xf32> -> vector<8x256xf32>
    %97 = arith.addf %91, %96 : vector<8x256xf32>
    %c2_99 = arith.constant 2 : index
    %c0_100 = arith.constant 0 : index
    %c0_101 = arith.constant 0 : index
    %98 = vector.load %arg2[%c2_99, %c0_100, %c0_101] : memref<4x8x64xf32, #tpu.memory_space<vmem>>, vector<1x8x64xf32>
    %99 = vector.shape_cast %98 : vector<1x8x64xf32> to vector<8x64xf32>
    %c7_102 = arith.constant 7 : index
    %c0_103 = arith.constant 0 : index
    %c0_104 = arith.constant 0 : index
    %100 = vector.load %arg1[%c7_102, %c0_103, %c0_104] : memref<9x64x256xf32, #tpu.memory_space<vmem>>, vector<1x64x256xf32>
    %101 = vector.shape_cast %100 : vector<1x64x256xf32> to vector<64x256xf32>
    %cst_105 = arith.constant dense<0.000000e+00> : vector<8x256xf32>
    %102 = tpu.matmul %99, %101, %cst_105 {dimension_numbers = #tpu.dot_dimension_numbers<[1], [0], [0], [1], [0, 0, 1, 1], [], []>} : vector<8x64xf32>, vector<64x256xf32>, vector<8x256xf32> -> vector<8x256xf32>
    %103 = arith.addf %97, %102 : vector<8x256xf32>
    %c3_106 = arith.constant 3 : index
    %c0_107 = arith.constant 0 : index
    %c0_108 = arith.constant 0 : index
    %104 = vector.load %arg2[%c3_106, %c0_107, %c0_108] : memref<4x8x64xf32, #tpu.memory_space<vmem>>, vector<1x8x64xf32>
    %105 = vector.shape_cast %104 : vector<1x8x64xf32> to vector<8x64xf32>
    %c8_109 = arith.constant 8 : index
    %c0_110 = arith.constant 0 : index
    %c0_111 = arith.constant 0 : index
    %106 = vector.load %arg1[%c8_109, %c0_110, %c0_111] : memref<9x64x256xf32, #tpu.memory_space<vmem>>, vector<1x64x256xf32>
    %107 = vector.shape_cast %106 : vector<1x64x256xf32> to vector<64x256xf32>
    %cst_112 = arith.constant dense<0.000000e+00> : vector<8x256xf32>
    %108 = tpu.matmul %105, %107, %cst_112 {dimension_numbers = #tpu.dot_dimension_numbers<[1], [0], [0], [1], [0, 0, 1, 1], [], []>} : vector<8x64xf32>, vector<64x256xf32>, vector<8x256xf32> -> vector<8x256xf32>
    %109 = arith.addf %103, %108 : vector<8x256xf32>
    %110 = vector.broadcast %0 : vector<8x1xf32> to vector<8x256xf32>
    %111 = arith.addf %109, %110 : vector<8x256xf32>
    %c24 = arith.constant 24 : index
    %c0_113 = arith.constant 0 : index
    %112 = vector.load %arg7[%c24, %c0_113] : memref<32x256xf32, #tpu.memory_space<vmem>>, vector<8x256xf32>
    tpu.vector_store %arg7[%c24, %c0_113], %111 {strides = array<i32>} : memref<32x256xf32, #tpu.memory_space<vmem>>, vector<8x256xf32>,
    %c0_114 = arith.constant 0 : index
    %c0_115 = arith.constant 0 : index
    %113 = vector.load %arg4[%c0_114, %c0_115] : memref<64x32xf32, #tpu.memory_space<vmem>>, vector<64x32xf32>
    %c0_116 = arith.constant 0 : index
    %c0_117 = arith.constant 0 : index
    %114 = vector.load %arg7[%c0_116, %c0_117] : memref<32x256xf32, #tpu.memory_space<vmem>>, vector<32x256xf32>
    %cst_118 = arith.constant dense<0.000000e+00> : vector<64x256xf32>
    %115 = tpu.matmul %113, %114, %cst_118 {dimension_numbers = #tpu.dot_dimension_numbers<[1], [0], [0], [1], [0, 0, 1, 1], [], []>} : vector<64x32xf32>, vector<32x256xf32>, vector<64x256xf32> -> vector<64x256xf32>
    %c0_119 = arith.constant 0 : index
    %c0_120 = arith.constant 0 : index
    %116 = vector.load %arg5[%c0_119, %c0_120] : memref<64x1xf32, #tpu.memory_space<vmem>>, vector<64x1xf32>
    %117 = vector.broadcast %116 : vector<64x1xf32> to vector<64x256xf32>
    %118 = arith.addf %115, %117 : vector<64x256xf32>
    %c0_121 = arith.constant 0 : index
    %c0_122 = arith.constant 0 : index
    %119 = vector.load %arg6[%c0_121, %c0_122] : memref<64x256xf32, #tpu.memory_space<vmem>>, vector<64x256xf32>
    tpu.vector_store %arg6[%c0_121, %c0_122], %118 {strides = array<i32>} : memref<64x256xf32, #tpu.memory_space<vmem>>, vector<64x256xf32>,
    return
  }
  func.func @transform_0(%arg0: i32) -> (i32, i32, i32) {
    %c0_i32 = arith.constant 0 : i32
    %c0_i32_0 = arith.constant 0 : i32
    %c0_i32_1 = arith.constant 0 : i32
    %c0_i32_2 = arith.constant 0 : i32
    return %c0_i32, %c0_i32_0, %c0_i32_1 : i32, i32, i32
  }
  func.func @transform_1(%arg0: i32) -> (i32, i32, i32) {
    %c0_i32 = arith.constant 0 : i32
    %c0_i32_0 = arith.constant 0 : i32
    %c0_i32_1 = arith.constant 0 : i32
    %c0_i32_2 = arith.constant 0 : i32
    return %c0_i32, %c0_i32_0, %c0_i32_1 : i32, i32, i32
  }
  func.func @transform_2(%arg0: i32) -> (i32, i32) {
    %c0_i32 = arith.constant 0 : i32
    %c0_i32_0 = arith.constant 0 : i32
    %c0_i32_1 = arith.constant 0 : i32
    return %c0_i32, %c0_i32_0 : i32, i32
  }
  func.func @transform_3(%arg0: i32) -> (i32, i32) {
    %c0_i32 = arith.constant 0 : i32
    %c0_i32_0 = arith.constant 0 : i32
    %c0_i32_1 = arith.constant 0 : i32
    return %c0_i32, %c0_i32_0 : i32, i32
  }
  func.func @transform_4(%arg0: i32) -> (i32, i32) {
    %c0_i32 = arith.constant 0 : i32
    %c0_i32_0 = arith.constant 0 : i32
    %c0_i32_1 = arith.constant 0 : i32
    return %c0_i32, %c0_i32_0 : i32, i32
  }
  func.func @transform_5(%arg0: i32) -> (i32, i32) {
    %c0_i32 = arith.constant 0 : i32
    %c0_i32_0 = arith.constant 0 : i32
    %c0_i32_1 = arith.constant 0 : i32
    return %c0_i32, %c0_i32_0 : i32, i32
  }
}

</mosaic_0001>

<bundles_post_ra>
// kernel: model_forward.1
= control target key start
LH: loop header
LB: loop body
LE: loop exit
PB: predicated region body
PF: predicated region fallthrough
CT: control target
= control target key end

     0   :  { %v2316_v3 = vmov 0.0   ;;  %v2317_v35 = vmov 0   ;;  %vm57_vm0 = vcmask 523264   ;;  %vm1590_vm1 = vcmask 261120   ;;  %s3075_s0 = inlined_call_operand.vmem [shape: f32[9,64,256], index: 0, kind: input, shape index: {}]   ;;  %s3076_s1 = inlined_call_operand.vmem [shape: f32[4,8,64], index: 1, kind: input, shape index: {}]   ;;  %s3077_s2 = inlined_call_operand.vmem [shape: f32[8,1], index: 2, kind: input, shape index: {}]   ;;  %s3078_s4 = inlined_call_operand.vmem [shape: f32[64,1], index: 4, kind: input, shape index: {}]   ;;  %s3079_s3 = inlined_call_operand.vmem [shape: f32[64,32], index: 3, kind: input, shape index: {}]   ;;  %s3080_s5 = inlined_call_operand.vmem [shape: f32[64,256], index: 5, kind: output, shape index: {}]  }
   0x1   :  { %v1750_v0 = vld [vmem:[%s3075_s0 + $0x88] sm:$0xff]  ;;  %v1752_v1 = vld [vmem:[%s3075_s0 + $0x98] sm:$0xff]  ;;  %125 = vmatprep.mubr.f32.mxu1 %v2316_v3  ;;  %199 = vmatprep.mubr.f32.mxu0 %v2316_v3  ;;  %v1749_v6 = vld [vmem:[%s3075_s0 + $0x80] sm:$0xff] }
   0x2   :  { %v23_v2 = vld [vmem:[%s3075_s0 + $0x8] sm:$0xff]  ;;  %v2359_v4 = vpack.c.bf16 %v1752_v1, %v1750_v0  ;;  %v25_v5 = vld [vmem:[%s3075_s0 + $0x18] sm:$0xff]  ;;  %v1751_v7 = vld [vmem:[%s3075_s0 + $0x90] sm:$0xff]  ;;  %2314 = vset.pattern.permute.xlu0 %v2317_v35  ;;  %2315 = vset.pattern.permute.xlu1 %v2317_v35 }
   0x3   :  { %v2040_v8 = vpack.c.bf16 %v25_v5, %v23_v2  ;;  %v2370_v9 = vpack.c.bf16 %v1751_v7, %v1749_v6  ;;  %v22_v10 = vld [vmem:[%s3075_s0] sm:$0xff]  ;;  %v24_v11 = vld [vmem:[%s3075_s0 + $0x10] sm:$0xff]  ;;  %v1754_v12 = vld [vmem:[%s3075_s0 + $0xa8] sm:$0xff] }
   0x4   :  { %2025 = vmatprep.subr.bf16.mxu1 %v2359_v4  ;;  %v2042_v13 = vpack.c.bf16 %v24_v11, %v22_v10  ;;  %v1756_v14 = vld [vmem:[%s3075_s0 + $0xb8] sm:$0xff]  ;;  %v27_v15 = vld [vmem:[%s3075_s0 + $0x28] sm:$0xff]  ;;  %v1753_v19 = vld [vmem:[%s3075_s0 + $0xa0] sm:$0xff] }
   0x5   :  { %v29_v16 = vld [vmem:[%s3075_s0 + $0x38] sm:$0xff]  ;;  %2041 = vmatprep.subr.bf16.mxu0 %v2040_v8  ;;  %2027 = vmatpush1.bf16.msra.mxu1 %v2370_v9  ;;  %v2392_v17 = vpack.c.bf16 %v1756_v14, %v1754_v12  ;;  %v1755_v20 = vld [vmem:[%s3075_s0 + $0xb0] sm:$0xff]  ;;  %v26_v21 = vld [vmem:[%s3075_s0 + $0x20] sm:$0xff] }
   0x6   :  { %v2044_v18 = vpack.c.bf16 %v29_v16, %v27_v15  ;;  %2043 = vmatpush1.bf16.msra.mxu0 %v2042_v13  ;;  %v2403_v22 = vpack.c.bf16 %v1755_v20, %v1753_v19  ;;  %v28_v23 = vld [vmem:[%s3075_s0 + $0x30] sm:$0xff]  ;;  %v1758_v24 = vld [vmem:[%s3075_s0 + $0xc8] sm:$0xff]  ;;  %v1760_v25 = vld [vmem:[%s3075_s0 + $0xd8] sm:$0xff] }
   0x7   :  { %2029 = vmatprep.subr.bf16.mxu1 %v2392_v17  ;;  %v2046_v26 = vpack.c.bf16 %v28_v23, %v26_v21  ;;  %v2415_v27 = vpack.c.bf16 %v1760_v25, %v1758_v24  ;;  %v31_v28 = vld [vmem:[%s3075_s0 + $0x48] sm:$0xff]  ;;  %v33_v29 = vld [vmem:[%s3075_s0 + $0x58] sm:$0xff]  ;;  %v1757_v30 = vld [vmem:[%s3075_s0 + $0xc0] sm:$0xff] }
   0x8   :  { %2045 = vmatprep.subr.bf16.mxu0 %v2044_v18  ;;  %v2048_v31 = vpack.c.bf16 %v33_v29, %v31_v28  ;;  %v1759_v32 = vld [vmem:[%s3075_s0 + $0xd0] sm:$0xff]  ;;  %v30_v33 = vld [vmem:[%s3075_s0 + $0x40] sm:$0xff]  ;;  %v1762_v37 = vld [vmem:[%s3075_s0 + $0xe8] sm:$0xff] }
   0x9   :  { %v32_v34 = vld [vmem:[%s3075_s0 + $0x50] sm:$0xff]  ;;  %2031 = vmatpush1.bf16.msra.mxu1 %v2403_v22  ;;  %v2436_v36 = vpack.c.bf16 %v1759_v32, %v1757_v30  ;;  %v1764_v38 = vld [vmem:[%s3075_s0 + $0xf8] sm:$0xff]  ;;  %v35_v39 = vld [vmem:[%s3075_s0 + $0x68] sm:$0xff] }
   0xa   :  { %2047 = vmatpush1.bf16.msra.mxu0 %v2046_v26  ;;  %2033 = vmatprep.subr.bf16.mxu1 %v2415_v27  ;;  %v2050_v40 = vpack.c.bf16 %v32_v34, %v30_v33  ;;  %v2448_v41 = vpack.c.bf16 %v1764_v38, %v1762_v37  ;;  %v37_v42 = vld [vmem:[%s3075_s0 + $0x78] sm:$0xff]  ;;  %v1761_v43 = vld [vmem:[%s3075_s0 + $0xe0] sm:$0xff]  ;;  %v1763_v44 = vld [vmem:[%s3075_s0 + $0xf0] sm:$0xff] }
   0xb   :  { %2049 = vmatprep.subr.bf16.mxu0 %v2048_v31  ;;  %v2052_v45 = vpack.c.bf16 %v37_v42, %v35_v39  ;;  %v34_v46 = vld [vmem:[%s3075_s0 + $0x60] sm:$0xff]  ;;  %v36_v47 = vld [vmem:[%s3075_s0 + $0x70] sm:$0xff]  ;;  %v1769_v48 = vld [vmem:[%s3075_s0 + $0x188] sm:$0xff]  ;;  %v2475_v51 = vpack.c.bf16 %v1763_v44, %v1761_v43 }
   0xc   :  { %v1771_v49 = vld [vmem:[%s3075_s0 + $0x198] sm:$0xff]  ;;  %v1821_v50 = vld [vmem:[%s3075_s0 + $0x108] sm:$0xff]  ;;  %v2054_v53 = vpack.c.bf16 %v36_v47, %v34_v46  ;;  %v1820_v55 = vld [vmem:[%s3075_s0 + $0x100] sm:$0xff] }
   0xd   :  { %2035 = vmatpush1.bf16.msra.mxu1 %v2436_v36  ;;  %v1823_v52 = vld [vmem:[%s3075_s0 + $0x118] sm:$0xff]  ;;  %v1822_v56 = vld [vmem:[%s3075_s0 + $0x110] sm:$0xff]  ;;  %v2487_v57 = vpack.c.bf16 %v1771_v49, %v1769_v48  ;;  %v1768_v58 = vld [vmem:[%s3075_s0 + $0x180] sm:$0xff] }
   0xe   :  { %2051 = vmatpush1.bf16.msra.mxu0 %v2050_v40  ;;  %2037 = vmatprep.subr.bf16.mxu1 %v2448_v41  ;;  %v2088_v54 = vpack.c.bf16 %v1823_v52, %v1821_v50  ;;  %v1770_v59 = vld [vmem:[%s3075_s0 + $0x190] sm:$0xff]  ;;  %v1825_v60 = vld [vmem:[%s3075_s0 + $0x128] sm:$0xff]  ;;  %v1775_v62 = vld [vmem:[%s3075_s0 + $0x1b8] sm:$0xff]  ;;  %v2090_v2 = vpack.c.bf16 %v1822_v56, %v1820_v55 }
   0xf   :  { %2053 = vmatprep.subr.bf16.mxu0 %v2052_v45  ;;  %v1773_v61 = vld [vmem:[%s3075_s0 + $0x1a8] sm:$0xff]  ;;  %v1827_v63 = vld [vmem:[%s3075_s0 + $0x138] sm:$0xff]  ;;  %v2516_v1 = vld [vmem:[%s3076_s1] sm:$0xff]  ;;  %v2518_v5 = vpack.c.bf16 %v1770_v59, %v1768_v58 }
  0x10   :  { %v2511_v0 = vld [vmem:[%s3076_s1 + $0x8] sm:$0xff]  ;;  %v2092_v6 = vpack.c.bf16 %v1827_v63, %v1825_v60  ;;  %v1772_v7 = vld [vmem:[%s3075_s0 + $0x1a0] sm:$0xff]  ;;  %v1826_v10 = vld [vmem:[%s3075_s0 + $0x130] sm:$0xff]  ;;  %v2530_v11 = vpack.c.bf16 %v1775_v62, %v1773_v61 }
  0x11   :  { %2039 = vmatpush1.bf16.msra.mxu1 %v2475_v51  ;;  %v1824_v8 = vld [vmem:[%s3075_s0 + $0x120] sm:$0xff]  ;;  %v1774_v12 = vld [vmem:[%s3075_s0 + $0x1b0] sm:$0xff]  ;;  %v1829_v13 = vld [vmem:[%s3075_s0 + $0x148] sm:$0xff] }
  0x12   :  { %2055 = vmatpush1.bf16.msra.mxu0 %v2054_v53  ;;  %2089 = vmatprep.subr.bf16.mxu1 %v2088_v54  ;;  %v1831_v14 = vld [vmem:[%s3075_s0 + $0x158] sm:$0xff]  ;;  %v1777_v15 = vld [vmem:[%s3075_s0 + $0x1c8] sm:$0xff]  ;;  %v2094_v18 = vpack.c.bf16 %v1826_v10, %v1824_v8  ;;  %v2552_v19 = vpack.c.bf16 %v1774_v12, %v1772_v7  ;;  %v1776_v21 = vld [vmem:[%s3075_s0 + $0x1c0] sm:$0xff] }
  0x13   :  { %2057 = vmatprep.subr.bf16.mxu0 %v2487_v57  ;;  %v1779_v16 = vld [vmem:[%s3075_s0 + $0x1d8] sm:$0xff]  ;;  %v2096_v20 = vpack.c.bf16 %v1831_v14, %v1829_v13  ;;  %v1828_v23 = vld [vmem:[%s3075_s0 + $0x140] sm:$0xff]  ;;  %v1830_v24 = vld [vmem:[%s3075_s0 + $0x150] sm:$0xff] }
  0x14   :  { %1765 = vmatmul.mubr.msk.f32.vlgmr.msra.gmra.mrb[0].mxu1 %vm57_vm0, %v2511_v0  ;;  %v2564_v25 = vpack.c.bf16 %v1779_v16, %v1777_v15  ;;  %v1778_v26 = vld [vmem:[%s3075_s0 + $0x1d0] sm:$0xff]  ;;  %v1833_v28 = vld [vmem:[%s3075_s0 + $0x168] sm:$0xff]  ;;  %v1835_v29 = vld [vmem:[%s3075_s0 + $0x178] sm:$0xff]  ;;  %v2098_v32 = vpack.c.bf16 %v1830_v24, %v1828_v23 }
  0x15   :  { %1766 = vmatmul.mubr.msk.f32.vlgmr.msra.gmra.mrb[0].mxu0 %vm57_vm0, %v2516_v1  ;;  %2091 = vmatpush1.bf16.msra.mxu1 %v2090_v2  ;;  %v1781_v30 = vld [vmem:[%s3075_s0 + $0x1e8] sm:$0xff]  ;;  %v1783_v31 = vld [vmem:[%s3075_s0 + $0x1f8] sm:$0xff]  ;;  %v2584_v33 = vpack.c.bf16 %v1778_v26, %v1776_v21  ;;  %v2100_v34 = vpack.c.bf16 %v1835_v29, %v1833_v28  ;;  %v1832_v35 = vld [vmem:[%s3075_s0 + $0x160] sm:$0xff] }
  0x16   :  { %2059 = vmatpush1.bf16.msra.mxu0 %v2518_v5  ;;  %2093 = vmatprep.subr.bf16.mxu1 %v2092_v6  ;;  %v1834_v37 = vld [vmem:[%s3075_s0 + $0x170] sm:$0xff]  ;;  %v2593_v38 = vpack.c.bf16 %v1783_v31, %v1781_v30  ;;  %v1780_v39 = vld [vmem:[%s3075_s0 + $0x1e0] sm:$0xff]  ;;  %v1787_v42 = vld [vmem:[%s3075_s0 + $0x208] sm:$0xff] }
  0x17   :  { %2061 = vmatprep.subr.bf16.mxu0 %v2530_v11  ;;  %292 = vmatprep.mubr.f32.mxu0 %v2316_v3  ;;  %v1782_v40 = vld [vmem:[%s3075_s0 + $0x1f0] sm:$0xff]  ;;  %v1789_v43 = vld [vmem:[%s3075_s0 + $0x218] sm:$0xff]  ;;  %v2102_v44 = vpack.c.bf16 %v1834_v37, %v1832_v35  ;;  %v1786_v47 = vld [vmem:[%s3075_s0 + $0x200] sm:$0xff] }
  0x18   :  { %507 = vmatprep.mubr.f32.mxu1 %v2316_v3  ;;  %v2608_v45 = vpack.c.bf16 %v1782_v40, %v1780_v39  ;;  %v2611_v46 = vpack.c.bf16 %v1789_v43, %v1787_v42  ;;  %v1788_v48 = vld [vmem:[%s3075_s0 + $0x210] sm:$0xff]  ;;  %v1791_v49 = vld [vmem:[%s3075_s0 + $0x228] sm:$0xff]  ;;  %v1793_v50 = vld [vmem:[%s3075_s0 + $0x238] sm:$0xff] }
  0x19   :  { %2095 = vmatpush1.bf16.msra.mxu1 %v2094_v18  ;;  %v2630_v52 = vld [vmem:[%s3076_s1 + $0x10] sm:$0xff]  ;;  %v2632_v53 = vpack.c.bf16 %v1788_v48, %v1786_v47  ;;  %v2635_v54 = vpack.c.bf16 %v1793_v50, %v1791_v49  ;;  %v1790_v55 = vld [vmem:[%s3075_s0 + $0x220] sm:$0xff]  ;;  %v1797_v58 = vld [vmem:[%s3075_s0 + $0x258] sm:$0xff] }
  0x1a   :  { %2063 = vmatpush1.bf16.msra.mxu0 %v2552_v19  ;;  %2097 = vmatprep.subr.bf16.mxu1 %v2096_v20  ;;  %v1792_v56 = vld [vmem:[%s3075_s0 + $0x230] sm:$0xff]  ;;  %v1794_v61 = vld [vmem:[%s3075_s0 + $0x240] sm:$0xff]  ;;  %v1547_v8 = vld [vmem:[%s3078_s4 + $0x28] sm:$0xff] }
  0x1b   :  { %2065 = vmatprep.subr.bf16.mxu0 %v2564_v25  ;;  %v2656_v59 = vpack.c.bf16 %v1792_v56, %v1790_v55  ;;  %v1796_v62 = vld [vmem:[%s3075_s0 + $0x250] sm:$0xff]  ;;  %v1798_v6 = vld [vmem:[%s3075_s0 + $0x260] sm:$0xff]  ;;  %v1858_v10 = vld [vmem:[%s3075_s0 + $0x288] sm:$0xff] }
  0x1c   :  { %v2678_v63 = vpack.c.bf16 %v1796_v62, %v1794_v61  ;;  %v1800_v7 = vld [vmem:[%s3075_s0 + $0x270] sm:$0xff]  ;;  %v1860_v12 = vld [vmem:[%s3075_s0 + $0x298] sm:$0xff]  ;;  %v1857_v15 = vld [vmem:[%s3075_s0 + $0x280] sm:$0xff] }
  0x1d   :  { %2099 = vmatpush1.bf16.msra.mxu1 %v2098_v32  ;;  %v1549_v13 = vld [vmem:[%s3078_s4 + $0x38] sm:$0xff]  ;;  %v2136_v14 = vpack.c.bf16 %v1860_v12, %v1858_v10  ;;  %v1859_v16 = vld [vmem:[%s3075_s0 + $0x290] sm:$0xff]  ;;  %v1862_v18 = vld [vmem:[%s3075_s0 + $0x2a8] sm:$0xff] }
  0x1e   :  { %2067 = vmatpush1.bf16.msra.mxu0 %v2584_v33  ;;  %2101 = vmatprep.subr.bf16.mxu1 %v2100_v34  ;;  %v1864_v20 = vld [vmem:[%s3075_s0 + $0x2b8] sm:$0xff]  ;;  %v2138_v21 = vpack.c.bf16 %v1859_v16, %v1857_v15  ;;  %v1861_v24 = vld [vmem:[%s3075_s0 + $0x2a0] sm:$0xff]  ;;  %v1863_v26 = vld [vmem:[%s3075_s0 + $0x2b0] sm:$0xff] }
  0x1f   :  { %2069 = vmatprep.subr.bf16.mxu0 %v2593_v38  ;;  %v2140_v23 = vpack.c.bf16 %v1864_v20, %v1862_v18  ;;  %v1866_v28 = vld [vmem:[%s3075_s0 + $0x2c8] sm:$0xff]  ;;  %v1868_v29 = vld [vmem:[%s3075_s0 + $0x2d8] sm:$0xff]  ;;  %v2142_v30 = vpack.c.bf16 %v1863_v26, %v1861_v24  ;;  %v1865_v31 = vld [vmem:[%s3075_s0 + $0x2c0] sm:$0xff] }
  0x20   :  { %v1867_v32 = vld [vmem:[%s3075_s0 + $0x2d0] sm:$0xff]  ;;  %v1870_v34 = vld [vmem:[%s3075_s0 + $0x2e8] sm:$0xff]  ;;  %v1914_v49 = vld [vmem:[%s3075_s0 + $0x320] sm:$0xff] }
  0x21   :  { %2103 = vmatpush1.bf16.msra.mxu1 %v2102_v44  ;;  %v2146_v35 = vpack.c.bf16 %v1867_v32, %v1865_v31  ;;  %v1871_v39 = vld [vmem:[%s3075_s0 + $0x2f0] sm:$0xff]  ;;  %v1911_v40 = vld [vmem:[%s3075_s0 + $0x308] sm:$0xff]  ;;  %v1928_v12 = vld [vmem:[%s3075_s0 + $0x380] sm:$0xff] }
  0x22   :  { %2071 = vmatpush1.bf16.msra.mxu0 %v2608_v45  ;;  %2105 = vmatprep.subr.bf16.mxu1 %v2359_v4  ;;  %v1795_v4 = vld [vmem:[%s3075_s0 + $0x248] sm:$0xff]  ;;  %v1912_v44 = vld [vmem:[%s3075_s0 + $0x310] sm:$0xff]  ;;  %v1935_v15 = vld [vmem:[%s3075_s0 + $0x3b8] sm:$0xff] }
  0x23   :  { %2073 = vmatprep.subr.bf16.mxu0 %v2611_v46  ;;  %v2659_v60 = vpack.c.bf16 %v1797_v58, %v1795_v4  ;;  %v1915_v47 = vld [vmem:[%s3075_s0 + $0x328] sm:$0xff]  ;;  %v1916_v50 = vld [vmem:[%s3075_s0 + $0x330] sm:$0xff]  ;;  %v1918_v58 = vld [vmem:[%s3075_s0 + $0x340] sm:$0xff] }
  0x24   :  { %1836 = vmatmul.mubr.msk.f32.vlgmr.msra.gmra.mrb[2].mxu1 %vm57_vm0, %v2511_v0  ;;  %v1919_v55 = vld [vmem:[%s3075_s0 + $0x348] sm:$0xff]  ;;  %v2190_v56 = vpack.c.bf16 %v1916_v50, %v1914_v49  ;;  %v1920_v61 = vld [vmem:[%s3075_s0 + $0x350] sm:$0xff]  ;;  %v1932_v20 = vld [vmem:[%s3075_s0 + $0x3a0] sm:$0xff] }
  0x25   :  { %1784 = vmatmul.mubr.msk.f32.vlgmr.msra.gmra.mrb[0].mxu0 %vm57_vm0, %v2630_v52  ;;  %2107 = vmatpush1.bf16.msra.mxu1 %v2370_v9  ;;  %v1799_v9 = vld [vmem:[%s3075_s0 + $0x268] sm:$0xff]  ;;  %v1942_v31 = vld [vmem:[%s3075_s0 + $0x3f0] sm:$0xff] }
  0x26   :  { %2075 = vmatpush1.bf16.msra.mxu0 %v2632_v53  ;;  %2109 = vmatprep.subr.bf16.mxu1 %v2392_v17  ;;  %v1801_v17 = vld [vmem:[%s3075_s0 + $0x278] sm:$0xff]  ;;  %v1923_v62 = vld [vmem:[%s3075_s0 + $0x368] sm:$0xff] }
  0x27   :  { %2077 = vmatprep.subr.bf16.mxu0 %v2635_v54  ;;  %387 = vmatprep.mubr.f32.mxu0 %v2316_v3  ;;  %v2681_v2 = vpack.c.bf16 %v1801_v17, %v1799_v9  ;;  %v1925_v9 = vld [vmem:[%s3075_s0 + $0x378] sm:$0xff]  ;;  %v2194_v17 = vpack.c.bf16 %v1920_v61, %v1918_v58  ;;  %v2004_v32 = vld [vmem:[%s3075_s0 + $0x428] sm:$0xff] }
  0x28   :  { %581 = vmatprep.mubr.f32.mxu1 %v2316_v3  ;;  %v1543_v61 = vld [vmem:[%s3078_s4 + $0x8] sm:$0xff] }
  0x29   :  { %2111 = vmatpush1.bf16.msra.mxu1 %v2403_v22  ;;  %v2692_v22 = vpack.c.bf16 %v1800_v7, %v1798_v6  ;;  %v2196_v6 = vpack.c.bf16 %v1925_v9, %v1923_v62  ;;  %v1922_v7 = vld [vmem:[%s3075_s0 + $0x360] sm:$0xff]  ;;  %1557 = vperm.xlu1 %2315, %v1543_v61   ;;  %v1544_v62 = vld [vmem:[%s3078_s4 + $0x10] sm:$0xff] }
  0x2a   :  { %2079 = vmatpush1.bf16.msra.mxu0 %v2656_v59  ;;  %2113 = vmatprep.subr.bf16.mxu1 %v2415_v27  ;;  %v20_v27 = vld [vmem:[%s3077_s2] sm:$0xff]  ;;  %v1548_v9 = vld [vmem:[%s3078_s4 + $0x30] sm:$0xff] }
  0x2b   :  { %2081 = vmatprep.subr.bf16.mxu0 %v2659_v60  ;;  %398 = vperm.xlu0 %2314, %v20_v27   ;;  %v1924_v27 = vld [vmem:[%s3075_s0 + $0x370] sm:$0xff] }
  0x2d   :  { %2115 = vmatpush1.bf16.msra.mxu1 %v2436_v36  ;;  %v2703_v36 = vld [vmem:[%s3076_s1 + $0x18] sm:$0xff]  ;;  %1562 = vperm.xlu1 %2315, %v1544_v62  }
  0x2e   :  { %2083 = vmatpush1.bf16.msra.mxu0 %v2678_v63  ;;  %2117 = vmatprep.subr.bf16.mxu1 %v2448_v41  ;;  %v1542_v41 = vld [vmem:[%s3078_s4] sm:$0xff] }
  0x2f   :  { %2085 = vmatprep.subr.bf16.mxu0 %v2681_v2  ;;  %1552 = vperm.xlu0 %2314, %v1542_v41   ;;  %v1929_v41 = vld [vmem:[%s3075_s0 + $0x388] sm:$0xff] }
  0x31   :  { %2119 = vmatpush1.bf16.msra.mxu1 %v2475_v51  ;;  %v1545_v51 = vld [vmem:[%s3078_s4 + $0x18] sm:$0xff] }
  0x32   :  { %2087 = vmatpush1.bf16.msra.mxu0 %v2692_v22  ;;  %2121 = vmatprep.subr.bf16.mxu1 %v2611_v46 }
  0x33   :  { %2153 = vmatprep.subr.bf16.mxu0 %v2611_v46  ;;  %1567 = vperm.xlu0 %2314, %v1545_v51   ;;  %v1931_v51 = vld [vmem:[%s3075_s0 + $0x398] sm:$0xff] }
  0x34   :  { %1837 = vmatmul.mubr.msk.f32.vlgmr.msra.gmra.mrb[2].mxu1 %vm57_vm0, %v2516_v1  ;;  %v2200_v10 = vpack.c.bf16 %v1931_v51, %v1929_v41 }
  0x35   :  { %1802 = vmatmul.mubr.msk.f32.vlgmr.msra.gmra.mrb[0].mxu0 %vm57_vm0, %v2703_v36  ;;  %2123 = vmatpush1.bf16.msra.mxu1 %v2632_v53 }
  0x36   :  { %2155 = vmatpush1.bf16.msra.mxu0 %v2632_v53  ;;  %2125 = vmatprep.subr.bf16.mxu1 %v2635_v54 }
  0x37   :  { %2157 = vmatprep.subr.bf16.mxu0 %v2635_v54  ;;  %672 = vmatprep.mubr.f32.mxu1 %v2316_v3 }
  0x38   :  { %880 = vmatprep.mubr.f32.mxu0 %v2316_v3  ;;  %1577 = vperm.xlu0 %2314, %v1547_v8   ;;  %v2198_v8 = vpack.c.bf16 %v1924_v27, %v1922_v7 }
  0x39   :  { %2127 = vmatpush1.bf16.msra.mxu1 %v2656_v59 }
  0x3a   :  { %2159 = vmatpush1.bf16.msra.mxu0 %v2656_v59  ;;  %2129 = vmatprep.subr.bf16.mxu1 %v2659_v60 }
  0x3b   :  { %2161 = vmatprep.subr.bf16.mxu0 %v2659_v60 }
  0x3c   :  { %1587 = vperm.xlu0 %2314, %v1549_v13   ;;  %v1930_v13 = vld [vmem:[%s3075_s0 + $0x390] sm:$0xff] }
  0x3d   :  { %2131 = vmatpush1.bf16.msra.mxu1 %v2678_v63  ;;  %v2202_v16 = vpack.c.bf16 %v1930_v13, %v1928_v12 }
  0x3e   :  { %2163 = vmatpush1.bf16.msra.mxu0 %v2678_v63  ;;  %2133 = vmatprep.subr.bf16.mxu1 %v2681_v2 }
  0x3f   :  { %2165 = vmatprep.subr.bf16.mxu0 %v2681_v2 }
  0x41   :  { %2135 = vmatpush1.bf16.msra.mxu1 %v2692_v22 }
  0x42   :  { %2167 = vmatpush1.bf16.msra.mxu0 %v2692_v22  ;;  %2137 = vmatprep.subr.bf16.mxu1 %v2136_v14 }
  0x43   :  { %2169 = vmatprep.subr.bf16.mxu0 %v2487_v57  ;;  %v2144_v57 = vpack.c.bf16 %v1868_v29, %v1866_v28  ;;  %v1938_v28 = vld [vmem:[%s3075_s0 + $0x3d0] sm:$0xff] }
  0x44   :  { %1855 = vmatmul.mubr.msk.f32.vlgmr.msra.gmra.mrb[2].mxu1 %vm57_vm0, %v2630_v52 }
  0x45   :  { %2139 = vmatpush1.bf16.msra.mxu1 %v2138_v21  ;;  %1907 = vmatmul.mubr.msk.f32.vlgmr.msra.gmra.mrb[2].mxu0 %vm57_vm0, %v2511_v0 }
  0x46   :  { %2171 = vmatpush1.bf16.msra.mxu0 %v2518_v5  ;;  %2141 = vmatprep.subr.bf16.mxu1 %v2140_v23  ;;  %v1872_v5 = vld [vmem:[%s3075_s0 + $0x2f8] sm:$0xff] }
  0x47   :  { %2173 = vmatprep.subr.bf16.mxu0 %v2530_v11  ;;  %766 = vmatprep.mubr.f32.mxu1 %v2316_v3  ;;  %v2148_v37 = vpack.c.bf16 %v1872_v5, %v1870_v34  ;;  %v1869_v11 = vld [vmem:[%s3075_s0 + $0x2e0] sm:$0xff]  ;;  %v2006_v34 = vld [vmem:[%s3075_s0 + $0x438] sm:$0xff] }
  0x48   :  { %954 = vmatprep.mubr.f32.mxu0 %v2316_v3  ;;  %v2150_v42 = vpack.c.bf16 %v1871_v39, %v1869_v11  ;;  %v2005_v11 = vld [vmem:[%s3075_s0 + $0x430] sm:$0xff]  ;;  %v2008_v39 = vld [vmem:[%s3075_s0 + $0x448] sm:$0xff] }
  0x49   :  { %2143 = vmatpush1.bf16.msra.mxu1 %v2142_v30 }
  0x4a   :  { %2175 = vmatpush1.bf16.msra.mxu0 %v2552_v19  ;;  %2145 = vmatprep.subr.bf16.mxu1 %v2144_v57  ;;  %v1913_v19 = vld [vmem:[%s3075_s0 + $0x318] sm:$0xff] }
  0x4b   :  { %2177 = vmatprep.subr.bf16.mxu0 %v2564_v25  ;;  %v2184_v43 = vpack.c.bf16 %v1913_v19, %v1911_v40  ;;  %v1910_v25 = vld [vmem:[%s3075_s0 + $0x300] sm:$0xff]  ;;  %v2010_v40 = vld [vmem:[%s3075_s0 + $0x458] sm:$0xff] }
  0x4d   :  { %2147 = vmatpush1.bf16.msra.mxu1 %v2146_v35 }
  0x4e   :  { %2179 = vmatpush1.bf16.msra.mxu0 %v2584_v33  ;;  %2149 = vmatprep.subr.bf16.mxu1 %v2148_v37  ;;  %v1917_v33 = vld [vmem:[%s3075_s0 + $0x338] sm:$0xff] }
  0x4f   :  { %2181 = vmatprep.subr.bf16.mxu0 %v2593_v38  ;;  %v2186_v38 = vpack.c.bf16 %v1912_v44, %v1910_v25  ;;  %v2188_v48 = vpack.c.bf16 %v1917_v33, %v1915_v47  ;;  %v2009_v25 = vld [vmem:[%s3075_s0 + $0x450] sm:$0xff]  ;;  %v2012_v44 = vld [vmem:[%s3075_s0 + $0x468] sm:$0xff] }
  0x51   :  { %2151 = vmatpush1.bf16.msra.mxu1 %v2150_v42 }
  0x52   :  { %2183 = vmatpush1.bf16.msra.mxu0 %v2608_v45  ;;  %2217 = vmatprep.subr.bf16.mxu1 %v2136_v14  ;;  %v1921_v45 = vld [vmem:[%s3075_s0 + $0x358] sm:$0xff]  ;;  %v1933_v14 = vld [vmem:[%s3075_s0 + $0x3a8] sm:$0xff] }
  0x53   :  { %2185 = vmatprep.subr.bf16.mxu0 %v2184_v43  ;;  %v2192_v4 = vpack.c.bf16 %v1921_v45, %v1919_v55  ;;  %v2204_v18 = vpack.c.bf16 %v1935_v15, %v1933_v14  ;;  %v2007_v43 = vld [vmem:[%s3075_s0 + $0x440] sm:$0xff] }
  0x54   :  { %1873 = vmatmul.mubr.msk.f32.vlgmr.msra.gmra.mrb[2].mxu1 %vm57_vm0, %v2703_v36  ;;  %v2274_v47 = vpack.c.bf16 %v2009_v25, %v2007_v43 }
  0x55   :  { %1908 = vmatmul.mubr.msk.f32.vlgmr.msra.gmra.mrb[2].mxu0 %vm57_vm0, %v2516_v1  ;;  %2219 = vmatpush1.bf16.msra.mxu1 %v2138_v21  ;;  %v1934_v21 = vld [vmem:[%s3075_s0 + $0x3b0] sm:$0xff] }
  0x56   :  { %2187 = vmatpush1.bf16.msra.mxu0 %v2186_v38  ;;  %2221 = vmatprep.subr.bf16.mxu1 %v2140_v23  ;;  %v1937_v23 = vld [vmem:[%s3075_s0 + $0x3c8] sm:$0xff]  ;;  %v2206_v24 = vpack.c.bf16 %v1934_v21, %v1932_v20  ;;  %v2011_v38 = vld [vmem:[%s3075_s0 + $0x460] sm:$0xff] }
  0x57   :  { %2189 = vmatprep.subr.bf16.mxu0 %v2188_v48  ;;  %1046 = vmatprep.mubr.f32.mxu0 %v2316_v3  ;;  %v2013_v48 = vld [vmem:[%s3075_s0 + $0x470] sm:$0xff] }
  0x58   :  { %1254 = vmatprep.mubr.f32.mxu1 %v2316_v3  ;;  %v2278_v49 = vpack.c.bf16 %v2013_v48, %v2011_v38 }
  0x59   :  { %2223 = vmatpush1.bf16.msra.mxu1 %v2142_v30 }
  0x5a   :  { %2191 = vmatpush1.bf16.msra.mxu0 %v2190_v56  ;;  %2225 = vmatprep.subr.bf16.mxu1 %v2144_v57  ;;  %v1940_v57 = vld [vmem:[%s3075_s0 + $0x3e0] sm:$0xff] }
  0x5b   :  { %2193 = vmatprep.subr.bf16.mxu0 %v2192_v4 }
  0x5d   :  { %2227 = vmatpush1.bf16.msra.mxu1 %v2146_v35  ;;  %v2268_v35 = vpack.c.bf16 %v2006_v34, %v2004_v32 }
  0x5e   :  { %2195 = vmatpush1.bf16.msra.mxu0 %v2194_v17  ;;  %2229 = vmatprep.subr.bf16.mxu1 %v2148_v37  ;;  %v2003_v37 = vld [vmem:[%s3075_s0 + $0x420] sm:$0xff] }
  0x5f   :  { %2197 = vmatprep.subr.bf16.mxu0 %v2196_v6  ;;  %v2270_v19 = vpack.c.bf16 %v2005_v11, %v2003_v37 }
  0x61   :  { %2231 = vmatpush1.bf16.msra.mxu1 %v2150_v42  ;;  %v2272_v42 = vpack.c.bf16 %v2010_v40, %v2008_v39 }
  0x62   :  { %2199 = vmatpush1.bf16.msra.mxu0 %v2198_v8  ;;  %2233 = vmatprep.subr.bf16.mxu1 %v2611_v46  ;;  %v1939_v46 = vld [vmem:[%s3075_s0 + $0x3d8] sm:$0xff] }
  0x63   :  { %2201 = vmatprep.subr.bf16.mxu0 %v2200_v10  ;;  %v2208_v26 = vpack.c.bf16 %v1939_v46, %v1937_v23 }
  0x64   :  { %1978 = vmatmul.mubr.msk.f32.vlgmr.msra.gmra.mrb[4].mxu1 %vm57_vm0, %v2511_v0  ;;  %v1936_v0 = vld [vmem:[%s3075_s0 + $0x3c0] sm:$0xff] }
  0x65   :  { %1926 = vmatmul.mubr.msk.f32.vlgmr.msra.gmra.mrb[2].mxu0 %vm57_vm0, %v2630_v52  ;;  %2235 = vmatpush1.bf16.msra.mxu1 %v2632_v53  ;;  %v1941_v53 = vld [vmem:[%s3075_s0 + $0x3e8] sm:$0xff]  ;;  %v2210_v29 = vpack.c.bf16 %v1938_v28, %v1936_v0  ;;  %v1528_v28 = vld [vmem:[%s3079_s3 + $0x10] sm:$0xff] }
  0x66   :  { %2203 = vmatpush1.bf16.msra.mxu0 %v2202_v16  ;;  %2237 = vmatprep.subr.bf16.mxu1 %v2635_v54  ;;  %v1943_v54 = vld [vmem:[%s3075_s0 + $0x3f8] sm:$0xff]  ;;  %v1527_v0 = vld [vmem:[%s3079_s3 + $0x8] sm:$0xff] }
  0x67   :  { %2205 = vmatprep.subr.bf16.mxu0 %v2204_v18  ;;  %1140 = vmatprep.mubr.f32.mxu0 %v2316_v3  ;;  %v2212_v30 = vpack.c.bf16 %v1943_v54, %v1941_v53  ;;  %v1529_v53 = vld [vmem:[%s3079_s3 + $0x18] sm:$0xff]  ;;  %v1530_v54 = vld [vmem:[%s3079_s3 + $0x20] sm:$0xff] }
  0x68   :  { %1328 = vmatprep.mubr.f32.mxu1 %v2316_v3 }
  0x69   :  { %2239 = vmatpush1.bf16.msra.mxu1 %v2656_v59  ;;  %v2214_v59 = vpack.c.bf16 %v1942_v31, %v1940_v57  ;;  %v1533_v57 = vld [vmem:[%s3079_s3 + $0x38] sm:$0xff] }
  0x6a   :  { %2207 = vmatpush1.bf16.msra.mxu0 %v2206_v24  ;;  %2241 = vmatprep.subr.bf16.mxu1 %v2659_v60  ;;  %v2000_v60 = vld [vmem:[%s3075_s0 + $0x408] sm:$0xff] }
  0x6b   :  { %2209 = vmatprep.subr.bf16.mxu0 %v2208_v26 }
  0x6d   :  { %2243 = vmatpush1.bf16.msra.mxu1 %v2678_v63  ;;  %v2002_v63 = vld [vmem:[%s3075_s0 + $0x418] sm:$0xff] }
  0x6e   :  { %2211 = vmatpush1.bf16.msra.mxu0 %v2210_v29  ;;  %2245 = vmatprep.subr.bf16.mxu1 %v2681_v2  ;;  %v1999_v2 = vld [vmem:[%s3075_s0 + $0x400] sm:$0xff] }
  0x6f   :  { %2213 = vmatprep.subr.bf16.mxu0 %v2212_v30 }
  0x71   :  { %2247 = vmatpush1.bf16.msra.mxu1 %v2692_v22  ;;  %v2001_v22 = vld [vmem:[%s3075_s0 + $0x410] sm:$0xff] }
  0x72   :  { %2215 = vmatpush1.bf16.msra.mxu0 %v2214_v59  ;;  %2249 = vmatprep.subr.bf16.mxu1 %v2200_v10  ;;  %v2266_v5 = vpack.c.bf16 %v2001_v22, %v1999_v2 }
  0x74   :  { %1979 = vmatmul.mubr.msk.f32.vlgmr.msra.gmra.mrb[4].mxu1 %vm57_vm0, %v2516_v1  ;;  %v2264_v1 = vpack.c.bf16 %v2002_v63, %v2000_v60 }
  0x75   :  { %1944 = vmatmul.mubr.msk.f32.vlgmr.msra.gmra.mrb[2].mxu0 %vm57_vm0, %v2703_v36  ;;  %2251 = vmatpush1.bf16.msra.mxu1 %v2202_v16 }
  0x76   :  { %2253 = vmatprep.subr.bf16.mxu1 %v2204_v18  ;;  %1419 = vmatprep.mubr.f32.mxu1 %v2316_v3 }
  0x77   :  { %1679 = vmatprep.mubr.f32.mxu0 %v2316_v3 }
  0x79   :  { %2255 = vmatpush1.bf16.msra.mxu1 %v2206_v24 }
  0x7a   :  { %2257 = vmatprep.subr.bf16.mxu1 %v2208_v26  ;;  %v1526_v26 = vld [vmem:[%s3079_s3] sm:$0xff] }
  0x7d   :  { %2259 = vmatpush1.bf16.msra.mxu1 %v2210_v29  ;;  %v1531_v29 = vld [vmem:[%s3079_s3 + $0x28] sm:$0xff] }
  0x7e   :  { %2261 = vmatprep.subr.bf16.mxu1 %v2212_v30  ;;  %v1532_v30 = vld [vmem:[%s3079_s3 + $0x30] sm:$0xff] }
  0x81   :  { %2263 = vmatpush1.bf16.msra.mxu1 %v2214_v59 }
  0x82   :  { %2265 = vmatprep.subr.bf16.mxu1 %v2264_v1 }
  0x84   :  { %1997 = vmatmul.mubr.msk.f32.vlgmr.msra.gmra.mrb[4].mxu1 %vm57_vm0, %v2630_v52  ;;  %v2014_v52 = vld [vmem:[%s3075_s0 + $0x478] sm:$0xff] }
  0x85   :  { %2267 = vmatpush1.bf16.msra.mxu1 %v2266_v5  ;;  %1513 = vmatprep.mubr.f32.mxu1 %v2316_v3  ;;  %v2276_v33 = vpack.c.bf16 %v2014_v52, %v2012_v44 }
  0x86   :  { %2269 = vmatprep.subr.bf16.mxu1 %v2268_v35 }
  0x89   :  { %2271 = vmatpush1.bf16.msra.mxu1 %v2270_v19 }
  0x8a   :  { %2273 = vmatprep.subr.bf16.mxu1 %v2272_v42 }
  0x8d   :  { %2275 = vmatpush1.bf16.msra.mxu1 %v2274_v47 }
  0x8e   :  { %2277 = vmatprep.subr.bf16.mxu1 %v2276_v33 }
  0x91   :  { %2279 = vmatpush1.bf16.msra.mxu1 %v2278_v49 }
  0x94   :  { %2015 = vmatmul.mubr.msk.f32.vlgmr.msra.gmra.mrb[4].mxu1 %vm57_vm0, %v2703_v36  ;;  %v1546_v36 = vld [vmem:[%s3078_s4 + $0x20] sm:$0xff] }
  0x95   :  { %1572 = vperm.xlu1 %2315, %v1546_v36  }
  0x99   :  { %1582 = vperm.xlu1 %2315, %v1548_v9  }
  0xa8   :  { %v1558_v60 = vpop.permute.xlu1 %1557 }
  0xaa   :  { %v399_v17 = vpop.permute.xlu0 %398 }
  0xac   :  { %v1563_v5 = vpop.permute.xlu1 %1562 }
  0xae   :  { %v1553_v31 = vpop.permute.xlu0 %1552 }
  0xb2   :  { %v1568_v40 = vpop.permute.xlu0 %1567 }
  0xb7   :  { %v1578_v48 = vpop.permute.xlu0 %1577 }
  0xbb   :  { %v1588_v36 = vpop.permute.xlu0 %1587 }
  0xe7   :  { %v127_v50 = vpop.f32.mrb[0].mxu1 }
  0xe8   :  { %v129_v55 = vpop.f32.mrb[1].mxu1 }
 0x108   :  { %v389_v45 = vpop.f32.mrb[0].mxu0 }
 0x109   :  { %v2288_v56 = vadd.f32 %v389_v45, %v127_v50  ;;  %v391_v4 = vpop.f32.mrb[1].mxu0 }
 0x10a   :  { %v2289_v58 = vadd.f32 %v391_v4, %v129_v55 }
 0x10b   :  { %v401_v7 = vadd.f32 %v2288_v56, %v399_v17 }
 0x10c   :  { %v402_v51 = vadd.f32 %v2289_v58, %v399_v17 }
 0x114   :  { %v1573_v44 = vpop.permute.xlu1 %1572 }
 0x118   :  { %v1583_v56 = vpop.permute.xlu1 %1582 }
 0x127   :  { %v768_v6 = vpop.f32.mrb[2].mxu1 }
 0x128   :  { %v775_v27 = vadd.f32 %v768_v6, %v399_v17  ;;  %v770_v41 = vpop.f32.mrb[3].mxu1 }
 0x129   :  { %v776_v8 = vadd.f32 %v770_v41, %v399_v17 }
 0x12a   :  { %v2282_v10 = vpack.c.bf16 %v775_v27, %v401_v7 }
 0x12b   :  { %v2280_v12 = vpack.c.bf16 %v776_v8, %v402_v51 }
 0x12d   :  { %2281 = vmatprep.subr.bf16.mxu0 %v2280_v12 }
 0x12e   :  { %2283 = vmatpush1.bf16.msra.mxu0 %v2282_v10 }
 0x148   :  { %v1142_v13 = vpop.f32.mrb[2].mxu0 }
 0x149   :  { %v1144_v14 = vpop.f32.mrb[3].mxu0  ;;  %v1149_v16 = vadd.f32 %v1142_v13, %v399_v17 }
 0x14a   :  { %v1150_v21 = vadd.f32 %v1144_v14, %v399_v17 }
 0x167   :  { %v1515_v15 = vpop.f32.mrb[4].mxu1 }
 0x168   :  { %v1522_v18 = vadd.f32 %v1515_v15, %v399_v17  ;;  %v1517_v20 = vpop.f32.mrb[5].mxu1 }
 0x169   :  { %v1523_v23 = vadd.f32 %v1517_v20, %v399_v17 }
 0x16a   :  { %v2286_v46 = vpack.c.bf16 %v1522_v18, %v1149_v16 }
 0x16b   :  { %v2284_v24 = vpack.c.bf16 %v1523_v23, %v1150_v21 }
 0x16d   :  { %2285 = vmatprep.subr.bf16.mxu0 %v2284_v24 }
 0x16e   :  { %2287 = vmatpush1.bf16.msra.mxu0 %v2286_v46 }
 0x171   :  { %2016 = vmatmul.mubr.msk.f32.vlgmr.msra.gmra.mrb[4].mxu0 %vm1590_vm1, %v1526_v26 }
 0x172   :  { %1685 = vmatprep.mubr.f32.mxu0 %v2316_v3 }
 0x175   :  { %2017 = vmatmul.mubr.msk.f32.gmra.mrb[6].mxu0 %vm1590_vm1, %v1527_v0 }
 0x176   :  { %1691 = vmatprep.mubr.f32.mxu0 %v2316_v3 }
 0x179   :  { %2018 = vmatmul.mubr.msk.f32.gmra.mrb[8].mxu0 %vm1590_vm1, %v1528_v28 }
 0x17a   :  { %1697 = vmatprep.mubr.f32.mxu0 %v2316_v3 }
 0x17d   :  { %2019 = vmatmul.mubr.msk.f32.gmra.mrb[10].mxu0 %vm1590_vm1, %v1529_v53 }
 0x17e   :  { %1703 = vmatprep.mubr.f32.mxu0 %v2316_v3 }
 0x181   :  { %2020 = vmatmul.mubr.msk.f32.gmra.mrb[12].mxu0 %vm1590_vm1, %v1530_v54 }
 0x182   :  { %1709 = vmatprep.mubr.f32.mxu0 %v2316_v3 }
 0x185   :  { %2021 = vmatmul.mubr.msk.f32.gmra.mrb[14].mxu0 %vm1590_vm1, %v1531_v29 }
 0x186   :  { %1715 = vmatprep.mubr.f32.mxu0 %v2316_v3 }
 0x189   :  { %2022 = vmatmul.mubr.msk.f32.gmra.mrb[16].mxu0 %vm1590_vm1, %v1532_v30 }
 0x18a   :  { %1721 = vmatprep.mubr.f32.mxu0 %v2316_v3 }
 0x18d   :  { %2023 = vmatmul.mubr.msk.f32.gmra.mrb[18].mxu0 %vm1590_vm1, %v1533_v57 }
 0x244   :  { %v1681_v59 = vpop.f32.mrb[4].mxu0 }
 0x245   :  { %v1682_v63 = vadd.f32 %v1681_v59, %v1553_v31  ;;  %v1683_v1 = vpop.f32.mrb[5].mxu0 }
 0x246   :  { %v1684_v2 = vadd.f32 %v1683_v1, %v1553_v31 }
 0x247   :  { %1728 = vst [vmem:[%s3080_s5] sm:$0xff] %v1682_v63 }
 0x248   :  { %1729 = vst [vmem:[%s3080_s5 + $0x8] sm:$0xff] %v1684_v2  ;;  %v1687_v3 = vpop.f32.mrb[6].mxu0 }
 0x249   :  { %v1688_v22 = vadd.f32 %v1687_v3, %v1558_v60  ;;  %v1689_v32 = vpop.f32.mrb[7].mxu0 }
 0x24a   :  { %v1690_v34 = vadd.f32 %v1689_v32, %v1558_v60 }
 0x24b   :  { %1730 = vst [vmem:[%s3080_s5 + $0x10] sm:$0xff] %v1688_v22 }
 0x24c   :  { %1731 = vst [vmem:[%s3080_s5 + $0x18] sm:$0xff] %v1690_v34  ;;  %v1693_v35 = vpop.f32.mrb[8].mxu0 }
 0x24d   :  { %v1694_v37 = vadd.f32 %v1693_v35, %v1563_v5  ;;  %v1695_v11 = vpop.f32.mrb[9].mxu0 }
 0x24e   :  { %v1696_v39 = vadd.f32 %v1695_v11, %v1563_v5 }
 0x24f   :  { %1732 = vst [vmem:[%s3080_s5 + $0x20] sm:$0xff] %v1694_v37 }
 0x250   :  { %1733 = vst [vmem:[%s3080_s5 + $0x28] sm:$0xff] %v1696_v39  ;;  %v1699_v19 = vpop.f32.mrb[10].mxu0 }
 0x251   :  { %v1700_v42 = vadd.f32 %v1699_v19, %v1568_v40  ;;  %v1701_v43 = vpop.f32.mrb[11].mxu0 }
 0x252   :  { %v1702_v25 = vadd.f32 %v1701_v43, %v1568_v40 }
 0x253   :  { %1734 = vst [vmem:[%s3080_s5 + $0x30] sm:$0xff] %v1700_v42 }
 0x254   :  { %1735 = vst [vmem:[%s3080_s5 + $0x38] sm:$0xff] %v1702_v25  ;;  %v1705_v52 = vpop.f32.mrb[12].mxu0 }
 0x255   :  { %v1706_v47 = vadd.f32 %v1705_v52, %v1573_v44  ;;  %v1707_v33 = vpop.f32.mrb[13].mxu0 }
 0x256   :  { %v1708_v38 = vadd.f32 %v1707_v33, %v1573_v44 }
 0x257   :  { %1736 = vst [vmem:[%s3080_s5 + $0x40] sm:$0xff] %v1706_v47 }
 0x258   :  { %1737 = vst [vmem:[%s3080_s5 + $0x48] sm:$0xff] %v1708_v38  ;;  %v1711_v49 = vpop.f32.mrb[14].mxu0 }
 0x259   :  { %v1712_v50 = vadd.f32 %v1711_v49, %v1578_v48  ;;  %v1713_v55 = vpop.f32.mrb[15].mxu0 }
 0x25a   :  { %v1714_v45 = vadd.f32 %v1713_v55, %v1578_v48 }
 0x25b   :  { %1738 = vst [vmem:[%s3080_s5 + $0x50] sm:$0xff] %v1712_v50 }
 0x25c   :  { %1739 = vst [vmem:[%s3080_s5 + $0x58] sm:$0xff] %v1714_v45  ;;  %v1717_v4 = vpop.f32.mrb[16].mxu0 }
 0x25d   :  { %v1718_v58 = vadd.f32 %v1717_v4, %v1583_v56  ;;  %v1719_v61 = vpop.f32.mrb[17].mxu0 }
 0x25e   :  { %v1720_v62 = vadd.f32 %v1719_v61, %v1583_v56 }
 0x25f   :  { %1740 = vst [vmem:[%s3080_s5 + $0x60] sm:$0xff] %v1718_v58 }
 0x260   :  { %1741 = vst [vmem:[%s3080_s5 + $0x68] sm:$0xff] %v1720_v62  ;;  %v1723_v9 = vpop.f32.mrb[18].mxu0 }
 0x261   :  { %v1724_v17 = vadd.f32 %v1723_v9, %v1588_v36  ;;  %v1725_v6 = vpop.f32.mrb[19].mxu0 }
 0x262   :  { %v1726_v7 = vadd.f32 %v1725_v6, %v1588_v36 }
 0x263   :  { %1742 = vst [vmem:[%s3080_s5 + $0x70] sm:$0xff] %v1724_v17 }
 0x264   :  { %1743 = vst [vmem:[%s3080_s5 + $0x78] sm:$0xff] %v1726_v7 }

</bundles_post_ra>
